<compile_context>
chip_gen: v6e
topology: v6e:2x2x1
jax: 0.10.0
libtpu: 0.0.40
codegen_flags: <defaults>
</compile_context>

<pallas_src>
import jax
import jax.numpy as jnp
from jax.experimental import pallas as pl
from jax.experimental.pallas import tpu as pltpu

_LANE = 128  # lane width of a vreg (last dim)


def _round_up(x: int, m: int) -> int:
    return ((x + m - 1) // m) * m


def _round_down(x: int, m: int) -> int:
    return (x // m) * m


def _sublane(dtype) -> int:
    # Native sublane tiling: 8 rows for 32-bit, 16 for 16-bit, 32 for 8-bit.
    return 8 * (4 // jnp.dtype(dtype).itemsize)


def _target_block_bytes() -> int:
    # Bigger blocks on v7x-class chips (64 MiB VMEM/TC, 3.2 TB/s HBM) so the
    # ~0.35us per-grid-step overhead stays <10% of each step's DMA time.
    try:
        info = pltpu.get_tpu_info()
        vmem = getattr(info, "vmem_capacity_bytes", None)
        if vmem is not None and vmem <= 64 * 1024 * 1024:
            return 8 * 1024 * 1024  # v7x
    except Exception:
        pass
    return 4 * 1024 * 1024  # v5e / v6e


def _sample_layer_kernel(x_ref, w_ref, o_ref):
    # x_ref: (tile_b, tile_d); w_ref: (1, tile_d) broadcasts over the
    # sublane/batch axis. Single VPU multiply per vreg.
    o_ref[...] = x_ref[...] * w_ref[...]


def sample_layer(x: jax.Array, w: jax.Array) -> jax.Array:
    """Pallas implementation of SampleLayer.forward: x * w (w broadcasts).

    x: (batch, data_size), w: (data_size,)
    """
    batch, data_size = x.shape
    assert w.shape == (data_size,)
    # Keep torch-equivalent semantics; avoid surprise mixed-precision math if
    # dtypes ever diverge (no-op for the f32 contract).
    w = w.astype(x.dtype)
    w2d = w.reshape(1, data_size)

    itemsize = jnp.dtype(x.dtype).itemsize
    sub = _sublane(x.dtype)
    target = _target_block_bytes()

    padded_d = _round_up(data_size, _LANE)   # lane-block granularity only
    padded_b = _round_up(batch, sub)
    row_bytes = padded_d * itemsize

    if row_bytes <= target:
        # Full rows per block; tile over batch to hit the byte target.
        tile_d = padded_d
        tile_b = max(sub, _round_down(target // row_bytes, sub))
        tile_b = min(tile_b, padded_b)
    else:
        # Huge rows: take a thin batch slab and derive tile_d from the byte
        # target so blocks stay ~target-sized even for skinny-batch inputs.
        tile_b = min(padded_b, sub)
        tile_d = max(_LANE, _round_down(target // (tile_b * itemsize), _LANE))
        tile_d = min(tile_d, padded_d)

    # Degenerate-grid guard: ensure >=2 blocks for large arrays so both v7x
    # TensorCores get work (harmless on single-TC chips).
    total_bytes = batch * data_size * itemsize
    if total_bytes >= (2 << 20):
        while pl.cdiv(padded_d, tile_d) * pl.cdiv(batch, tile_b) < 2:
            if tile_b > sub:
                tile_b = max(sub, _round_down(tile_b // 2, sub))
            elif tile_d > _LANE:
                tile_d = max(_LANE, _round_down(tile_d // 2, _LANE))
            else:
                break

    n_d = pl.cdiv(padded_d, tile_d)
    n_b = pl.cdiv(batch, tile_b)
    # Lane blocks outermost, batch blocks innermost (fastest-varying): w's
    # block index (0, j) is constant across the inner sweep, so its DMA is
    # skipped until the lane block changes.
    grid = (n_d, n_b)

    block_bytes = tile_b * tile_d * itemsize
    # 2x double-buffered input + 2x double-buffered output + 2x w row.
    vmem_needed = 4 * block_bytes + 2 * tile_d * itemsize
    compiler_kwargs = dict(dimension_semantics=("parallel", "parallel"))
    if vmem_needed > (12 << 20):
        # Above v5e's 16 MiB scoped default; raise (well under physical VMEM
        # on every chip, incl. v7x's 64 MiB/TC).
        compiler_kwargs["vmem_limit_bytes"] = int(
            min(vmem_needed + (8 << 20), 60 << 20))

    cost = pl.CostEstimate(
        flops=batch * data_size,
        transcendentals=0,
        bytes_accessed=(2 * batch * data_size + data_size) * itemsize,
    )

    return pl.pallas_call(
        _sample_layer_kernel,
        out_shape=jax.ShapeDtypeStruct((batch, data_size), x.dtype),
        grid_spec=pltpu.PrefetchScalarGridSpec(
            num_scalar_prefetch=0,
            grid=grid,
            in_specs=[
                pl.BlockSpec((tile_b, tile_d), lambda j, i: (i, j)),
                pl.BlockSpec((1, tile_d), lambda j, i: (0, j)),
            ],
            out_specs=pl.BlockSpec((tile_b, tile_d), lambda j, i: (i, j)),
        ),
        compiler_params=pltpu.CompilerParams(**compiler_kwargs),
        cost_estimate=cost,
    )(x, w2d)


if __name__ == "__main__":
    key = jax.random.PRNGKey(0)

    # Case 1: data_size not a multiple of 128 -> partial (masked) lane block.
    batch1, d1 = 64, 200
    x1 = jax.random.normal(key, (batch1, d1), dtype=jnp.float32)
    # Parameter init matches torch.nn.Parameter(torch.ones([data_size])),
    # perturbed so the broadcast multiply is actually checked.
    w1 = jnp.ones((d1,), dtype=jnp.float32) + 0.25 * jnp.arange(
        d1, dtype=jnp.float32
    ) / d1

    out1 = jax.block_until_ready(sample_layer(x1, w1))
    ref1 = x1 * w1
    assert out1.shape == (batch1, d1)
    assert out1.dtype == jnp.float32
    assert jnp.allclose(out1, ref1, atol=1e-6, rtol=1e-6)

    # Case 2: lane-aligned data_size, batch not a multiple of 8 (masked rows).
    batch2, d2 = 300, 384
    key2 = jax.random.fold_in(key, 1)
    x2 = jax.random.normal(key2, (batch2, d2), dtype=jnp.float32)
    w2 = jnp.ones((d2,), dtype=jnp.float32)

    out2 = jax.block_until_ready(sample_layer(x2, w2))
    ref2 = x2 * w2
    assert out2.shape == (batch2, d2)
    assert jnp.allclose(out2, ref2, atol=1e-6, rtol=1e-6)

    # Case 3: tiny array, block larger than both array dims (fully masked tail).
    batch3, d3 = 4, 32
    key3 = jax.random.fold_in(key, 2)
    x3 = jax.random.normal(key3, (batch3, d3), dtype=jnp.float32)
    w3 = jnp.ones((d3,), dtype=jnp.float32) * 0.5

    out3 = jax.block_until_ready(sample_layer(x3, w3))
    assert jnp.allclose(out3, x3 * w3, atol=1e-6, rtol=1e-6)

    print("KERNEL_OK")
</pallas_src>

<mosaic_0001>
module attributes {stable_mosaic.version = 11 : i64} {
  func.func @_sample_layer_kernel(%arg0: i32, %arg1: i32, %arg2: memref<64x256xf32, #tpu.memory_space<vmem>>, %arg3: memref<1x256xf32, #tpu.memory_space<vmem>>, %arg4: memref<64x256xf32, #tpu.memory_space<vmem>>) attributes {dimension_semantics = [#tpu.dimension_semantics<parallel>, #tpu.dimension_semantics<parallel>], iteration_bounds = array<i64: 1, 1>, scalar_prefetch = 0 : i64, scratch_operands = 0 : i64, tpu.core_type = #tpu.core_type<tc>, window_params = [{transform_indices = @transform_0, window_bounds = array<i64: 64, 256>}, {transform_indices = @transform_1, window_bounds = array<i64: 1, 256>}, {transform_indices = @transform_2, window_bounds = array<i64: 64, 256>}]} {
    %c0 = arith.constant 0 : index
    %c0_0 = arith.constant 0 : index
    %0 = vector.load %arg2[%c0, %c0_0] : memref<64x256xf32, #tpu.memory_space<vmem>>, vector<64x256xf32>
    %c0_1 = arith.constant 0 : index
    %c0_2 = arith.constant 0 : index
    %1 = vector.load %arg3[%c0_1, %c0_2] : memref<1x256xf32, #tpu.memory_space<vmem>>, vector<1x256xf32>
    %2 = vector.broadcast %1 : vector<1x256xf32> to vector<64x256xf32>
    %3 = arith.mulf %0, %2 : vector<64x256xf32>
    %c0_3 = arith.constant 0 : index
    %c0_4 = arith.constant 0 : index
    %4 = vector.load %arg4[%c0_3, %c0_4] : memref<64x256xf32, #tpu.memory_space<vmem>>, vector<64x256xf32>
    tpu.vector_store %arg4[%c0_3, %c0_4], %3 {strides = array<i32>} : memref<64x256xf32, #tpu.memory_space<vmem>>, vector<64x256xf32>,
    return
  }
  func.func @transform_0(%arg0: i32, %arg1: i32) -> (i32, i32) {
    %c0_i32 = arith.constant 0 : i32
    return %arg1, %arg0 : i32, i32
  }
  func.func @transform_1(%arg0: i32, %arg1: i32) -> (i32, i32) {
    %c0_i32 = arith.constant 0 : i32
    %c0_i32_0 = arith.constant 0 : i32
    return %c0_i32, %arg0 : i32, i32
  }
  func.func @transform_2(%arg0: i32, %arg1: i32) -> (i32, i32) {
    %c0_i32 = arith.constant 0 : i32
    return %arg1, %arg0 : i32, i32
  }
}

</mosaic_0001>

<bundles_post_ra>
// kernel: tpu_custom_call.1
= control target key start
LH: loop header
LB: loop body
LE: loop exit
PB: predicated region body
PF: predicated region fallthrough
CT: control target
= control target key end

     0   :  { %7 = vsyncpa [#allocation3], 0  ;;  %s222_s0 = inlined_call_operand.hbm [shape: f32[64,200], index: 0, kind: input, shape index: {}]   ;;  %s223_s1 = inlined_call_operand.hbm [shape: f32[1,200], index: 1, kind: input, shape index: {}]   ;;  %s224_s2 = inlined_call_operand.hbm [shape: f32[64,200], index: 2, kind: output, shape index: {}]  }
   0x1   :  { %8 = vsyncpa [#allocation6], 0 }
   0x2   :  { %9 = vsyncpa [#allocation4], 0  ;;  %s187_s9 = smov [#allocation2]  }
   0x3   :  { %s15_s10 = sshll.u32 %s187_s9, 4  ;;  %s16_s10 = int_to_ptr.vmem [resolvable:$true] %s15_s10 }
   0x4   :  { %s129_s11 = scalar_lea.vmem %s16_s10, 2048  ;;  %p134_p1 = scmp.lt.s32.totalorder %s16_s10, %s16_s10 }
   0x5   :  { %p130_p0 = scmp.ne.s32.totalorder %s16_s10, %s129_s11  ;;  %p135_p2 = scmp.lt.s32.totalorder %s129_s11, %s129_s11 }
   0x7   :  { %p136_p3 = por %p135_p2, %p134_p1 }
   0x9   :  { %p137_p4 = pnand %p136_p3, %p130_p0 }
   0xb   :  { %140 = shalt.err (!%p137_p4)
}
   0xc   :  { %s188_s12 = smov 256   ;;  %s189_s13 = smov 16  }
   0xd   :  { %21 = dma.hbm_to_vmem [thread:$0]  %s222_s0, 2048, %s16_s10, [#allocation3], %s188_s12, %s188_s12, %s189_s13  }
   0xe   :  { %s190_s16 = smov [#allocation5]  }
   0xf   :  { %s28_s17 = sshll.u32 %s190_s16, 4  ;;  %s29_s17 = int_to_ptr.vmem [resolvable:$true] %s28_s17 }
  0x10   :  { %s149_s18 = scalar_lea.vmem %s29_s17, 32  ;;  %p154_p6 = scmp.lt.s32.totalorder %s29_s17, %s29_s17 }
  0x11   :  { %p150_p5 = scmp.ne.s32.totalorder %s29_s17, %s149_s18  ;;  %p155_p7 = scmp.lt.s32.totalorder %s149_s18, %s149_s18 }
  0x13   :  { %p156_p8 = por %p155_p7, %p154_p6 }
  0x15   :  { %p157_p9 = pnand %p156_p8, %p150_p5 }
  0x17   :  { %160 = shalt.err (!%p157_p9)
}
  0x18   :  { %31 = dma.hbm_to_vmem [thread:$0]  %s223_s1, 32, %s29_s17, [#allocation6]  }
  0x19   :  { %181 = dma.done.wait [#allocation3], 2048  }
  0x1a   :  { %182 = vsyncadd [#allocation3], 4294965248 }
  0x1b   :  { %183 = dma.done.wait [#allocation6], 32  }
  0x1c   :  { %184 = vsyncadd [#allocation6], 4294967264  ;;  %v56_v0 = vlaneseq  ;;  %v38_v4 = vld [vmem:[#allocation2] sm:$0xff]  ;;  %v39_v6 = vld [vmem:[#allocation2 + $0x8] sm:$0xff]  ;;  %s191_s0 = smov [#allocation7]  }
  0x1d   :  { %v54_v5 = vld [vmem:[#allocation5] sm:$0x3]  ;;  %v40_v9 = vld [vmem:[#allocation2 + $0x10] sm:$0xff]  ;;  %v41_v10 = vld [vmem:[#allocation2 + $0x18] sm:$0xff]  ;;  %s103_s1 = sshll.u32 %s191_s0, 4  ;;  %s104_s1 = int_to_ptr.vmem [resolvable:$true] %s103_s1 }
  0x1e   :  { %v57_v1 = vshrl.u32 %v56_v0, 7  ;;  %v42_v11 = vld [vmem:[#allocation2 + $0x20] sm:$0xff]  ;;  %v43_v12 = vld [vmem:[#allocation2 + $0x28] sm:$0xff]  ;;  %v44_v13 = vld [vmem:[#allocation2 + $0x30] sm:$0xff]  ;;  %s161_s21 = scalar_lea.vmem %s104_s1, 2048  ;;  %p166_p11 = scmp.lt.s32.totalorder %s104_s1, %s104_s1 }
  0x1f   :  { %v45_v14 = vld [vmem:[#allocation2 + $0x38] sm:$0xff]  ;;  %v46_v19 = vld [vmem:[#allocation2 + $0x40] sm:$0xff]  ;;  %v47_v20 = vld [vmem:[#allocation2 + $0x48] sm:$0xff]  ;;  %p162_p10 = scmp.ne.s32.totalorder %s104_s1, %s161_s21  ;;  %p167_p12 = scmp.lt.s32.totalorder %s161_s21, %s161_s21 }
  0x20   :  { %v58_v2 = vsub.s32 0, %v57_v1  ;;  %v62_v3 = vsub.s32 1, %v57_v1  ;;  %v48_v21 = vld [vmem:[#allocation2 + $0x50] sm:$0xff]  ;;  %v49_v26 = vld [vmem:[#allocation2 + $0x58] sm:$0xff]  ;;  %v50_v27 = vld [vmem:[#allocation2 + $0x60] sm:$0xff] }
  0x21   :  { %v51_v28 = vld [vmem:[#allocation2 + $0x68] sm:$0xff]  ;;  %v52_v33 = vld [vmem:[#allocation2 + $0x70] sm:$0xff]  ;;  %v53_v34 = vld [vmem:[#allocation2 + $0x78] sm:$0xff]  ;;  %p168_p13 = por %p167_p12, %p166_p11 }
  0x22   :  { %v59_v7 = vrot.slane %v54_v5, %v58_v2  ;;  %v63_v8 = vrot.slane %v54_v5, %v62_v3 }
  0x23   :  { %p169_p0 = pnand %p168_p13, %p162_p10 }
  0x24   :  { %v66_v15 = vmul.f32 %v59_v7, %v38_v4  ;;  %v67_v16 = vmul.f32 %v63_v8, %v39_v6  ;;  %v68_v17 = vmul.f32 %v59_v7, %v40_v9  ;;  %v69_v18 = vmul.f32 %v63_v8, %v41_v10 }
  0x25   :  { %v70_v22 = vmul.f32 %v59_v7, %v42_v11  ;;  %v71_v23 = vmul.f32 %v63_v8, %v43_v12  ;;  %v72_v24 = vmul.f32 %v59_v7, %v44_v13  ;;  %v73_v25 = vmul.f32 %v63_v8, %v45_v14 }
  0x26   :  { %82 = vst [vmem:[#allocation7] sm:$0xff] %v66_v15  ;;  %83 = vst [vmem:[#allocation7 + $0x8] sm:$0xff] %v67_v16  ;;  %v74_v29 = vmul.f32 %v59_v7, %v46_v19  ;;  %v75_v30 = vmul.f32 %v63_v8, %v47_v20  ;;  %v76_v31 = vmul.f32 %v59_v7, %v48_v21 }
  0x27   :  { %84 = vst [vmem:[#allocation7 + $0x10] sm:$0xff] %v68_v17  ;;  %85 = vst [vmem:[#allocation7 + $0x18] sm:$0xff] %v69_v18  ;;  %v77_v32 = vmul.f32 %v63_v8, %v49_v26  ;;  %v78_v35 = vmul.f32 %v59_v7, %v50_v27  ;;  %v79_v36 = vmul.f32 %v63_v8, %v51_v28 }
  0x28   :  { %86 = vst [vmem:[#allocation7 + $0x20] sm:$0xff] %v70_v22  ;;  %87 = vst [vmem:[#allocation7 + $0x28] sm:$0xff] %v71_v23  ;;  %v80_v37 = vmul.f32 %v59_v7, %v52_v33  ;;  %v81_v38 = vmul.f32 %v63_v8, %v53_v34 }
  0x29   :  { %88 = vst [vmem:[#allocation7 + $0x30] sm:$0xff] %v72_v24  ;;  %89 = vst [vmem:[#allocation7 + $0x38] sm:$0xff] %v73_v25 }
  0x2a   :  { %90 = vst [vmem:[#allocation7 + $0x40] sm:$0xff] %v74_v29  ;;  %91 = vst [vmem:[#allocation7 + $0x48] sm:$0xff] %v75_v30 }
  0x2b   :  { %92 = vst [vmem:[#allocation7 + $0x50] sm:$0xff] %v76_v31  ;;  %93 = vst [vmem:[#allocation7 + $0x58] sm:$0xff] %v77_v32 }
  0x2c   :  { %94 = vst [vmem:[#allocation7 + $0x60] sm:$0xff] %v78_v35  ;;  %95 = vst [vmem:[#allocation7 + $0x68] sm:$0xff] %v79_v36 }
  0x2d   :  { %96 = vst [vmem:[#allocation7 + $0x70] sm:$0xff] %v80_v37  ;;  %97 = vst [vmem:[#allocation7 + $0x78] sm:$0xff] %v81_v38 }
  0x2e   :  { %172 = shalt.err (!%p169_p0)
}
  0x2f   :  { %109 = dma.vmem_to_hbm [thread:$0]  %s104_s1, 2048, %s224_s2, [#allocation4], %s188_s12, %s188_s12, %s189_s13  }
  0x30   :  { %185 = dma.done.wait [#allocation4], 2048  }
  0x31   :  { %186 = vsyncadd [#allocation4], 4294965248 }
  0x32   :  { %113 = vsyncpa [#allocation3], 1 }
  0x33   :  { %114 = vsyncpa [#allocation6], 1 }
  0x34   :  { %115 = vsyncpa [#allocation4], 1 }

</bundles_post_ra>
